<compile_context>
chip_gen: v7x
topology: tpu7x:2x2x1
jax: 0.10.0
libtpu: 0.0.40
codegen_flags: <defaults>
</compile_context>

<pallas_src>
import functools
import math

import jax
import jax.numpy as jnp
from jax.experimental import pallas as pl
from jax.experimental.pallas import tpu as pltpu


def self_attention_layer_kernel(
    mx_ref,                         # (b_blk, P, S): rows 0..N-1 = memory, row N = x, rest zero pad
    wqkv_ref,                       # (S, 3S) fused [Wq*scale | Wk | Wv]
    wc_ref, bc_ref,
    gamma_ref, beta_ref,
    w1_ref, b1_ref, w2_ref, b2_ref, w3_ref, b3_ref,
    o_ref,                          # (b_blk, N, S)
    *, n_mem, n_head, n_kv,
):
    b_blk, p_rows, size = mx_ref.shape
    d = size // n_head

    mx3 = mx_ref[...]                                   # (b_blk, P, S)
    mx2 = mx3.reshape(b_blk * p_rows, size)             # sublane-aligned collapse (P % 8 == 0)

    # --- One fused QKV projection: tall (b_blk*P, S) x (S, 3S) MXU matmul.
    # 1/sqrt(d) is already folded into the Wq columns wrapper-side. ---
    qkv2 = jnp.dot(mx2, wqkv_ref[...], preferred_element_type=jnp.float32)
    qkv3 = qkv2.reshape(b_blk, p_rows, 3 * size)

    q3 = qkv3[:, :n_mem, 0 * size:1 * size]             # (b_blk, N,   S)  queries: memory rows only
    k3 = qkv3[:, :n_kv, 1 * size:2 * size]              # (b_blk, N+1, S)  keys: memory + x row
    v3 = qkv3[:, :n_kv, 2 * size:3 * size]              # (b_blk, N+1, S)

    # --- Scaled dot-product attention, batched over the whole batch block.
    # Loop length is n_head (constant), independent of b_blk. ---
    heads = []
    for h in range(n_head):
        c0 = h * d
        qh = q3[:, :, c0:c0 + d]                         # (b_blk, N,   d)
        kh = k3[:, :, c0:c0 + d]                         # (b_blk, N+1, d)
        vh = v3[:, :, c0:c0 + d]                         # (b_blk, N+1, d)
        s = jnp.einsum('bnd,bmd->bnm', qh, kh,
                       preferred_element_type=jnp.float32)           # (b_blk, N, N+1)
        s = s - jnp.max(s, axis=-1, keepdims=True)
        e = jnp.exp(s)
        # softmax normalization via EUP approximate reciprocal (frees VALU slots)
        p = e * pl.reciprocal(jnp.sum(e, axis=-1, keepdims=True), approx=True)
        heads.append(jnp.einsum('bnm,bmd->bnd', p, vh,
                                preferred_element_type=jnp.float32))  # (b_blk, N, d)

    # Lane-concatenate head outputs in registers; no VMEM scratch round trip.
    attn2 = jnp.concatenate(heads, axis=-1).reshape(b_blk * n_mem, size)
    mem2 = mx3[:, :n_mem, :].reshape(b_blk * n_mem, size)

    # --- Output projection (w_concat) + residual with memory. ---
    out = jnp.dot(attn2, wc_ref[...], preferred_element_type=jnp.float32) + bc_ref[...]
    x1 = out + mem2

    # --- LayerNorm over the feature dim (biased variance, eps=1e-5, affine). ---
    mean = jnp.mean(x1, axis=-1, keepdims=True)
    var = jnp.mean((x1 - mean) ** 2, axis=-1, keepdims=True)
    xn = (x1 - mean) * jax.lax.rsqrt(var + 1e-5) * gamma_ref[...] + beta_ref[...]

    # --- Attention MLP: Linear -> ReLU -> Linear -> ReLU -> Linear, then residual. ---
    h1 = jnp.maximum(
        jnp.dot(xn, w1_ref[...], preferred_element_type=jnp.float32) + b1_ref[...], 0.0)
    h2 = jnp.maximum(
        jnp.dot(h1, w2_ref[...], preferred_element_type=jnp.float32) + b2_ref[...], 0.0)
    h3 = jnp.dot(h2, w3_ref[...], preferred_element_type=jnp.float32) + b3_ref[...]

    o_ref[...] = (h3 + xn).reshape(b_blk, n_mem, size).astype(o_ref.dtype)


def _pick_batch_block(batch, rows_per_batch, size, *, target_bytes=1 << 20, min_grid=2):
    """Largest divisor b_blk of `batch` whose padded f32 input block stays under
    ~target_bytes, while keeping at least min(min_grid, batch) grid steps so v7x's two
    TensorCores both get work and the BlockSpec pipeline can overlap DMA with compute.
    The 1 MiB cap (double-buffered) also stays far under v5e's 16 MiB scoped-VMEM default."""
    want_grid = min(min_grid, batch)
    best = 1
    for blk in range(1, batch + 1):
        if batch % blk:
            continue
        if blk * rows_per_batch * size * 4 > target_bytes:
            continue
        if batch // blk < want_grid:
            continue
        best = blk
    return best


def self_attention_layer(memory, x, params, n_head):
    B, N, S = memory.shape
    assert S % n_head == 0
    d = S // n_head
    wq, wk, wv, wc, bc, gamma, beta, w1, b1, w2, b2, w3, b3 = params

    # Fused, pre-scaled QKV weight: one MXU weight sequence instead of three.
    wqkv = jnp.concatenate([wq * (1.0 / math.sqrt(d)), wk, wv], axis=1)      # (S, 3S)

    # Wrapper-side [memory; x] concat, padded so each batch occupies a sublane-aligned
    # row count (padded rows are zeros and are sliced away before attention).
    P = ((N + 1 + 7) // 8) * 8
    pad = jnp.zeros((B, P - (N + 1), S), memory.dtype)
    mx = jnp.concatenate([memory, x[:, None, :], pad], axis=1)               # (B, P, S)

    b_blk = _pick_batch_block(B, P, S)

    def wspec(shape):                      # whole-array (weight / bias) block
        return pl.BlockSpec(shape, lambda b: (0,) * len(shape))

    kernel = functools.partial(self_attention_layer_kernel,
                               n_mem=N, n_head=n_head, n_kv=N + 1)
    out = pl.pallas_call(
        kernel,
        out_shape=jax.ShapeDtypeStruct((B, N, S), memory.dtype),
        grid=(B // b_blk,),
        in_specs=[
            pl.BlockSpec((b_blk, P, S), lambda b: (b, 0, 0)),   # [memory; x] (padded)
            wspec((S, 3 * S)),                                  # fused Wqkv (scaled)
            wspec((S, S)), wspec((1, S)),                       # Wc, bc
            wspec((1, S)), wspec((1, S)),                       # gamma, beta
            wspec((S, S)), wspec((1, S)),                       # W1, b1
            wspec((S, S)), wspec((1, S)),                       # W2, b2
            wspec((S, S)), wspec((1, S)),                       # W3, b3
        ],
        out_specs=pl.BlockSpec((b_blk, N, S), lambda b: (b, 0, 0)),
        compiler_params=pltpu.CompilerParams(
            # batch blocks are independent -> shardable across v7x's 2 TensorCores
            dimension_semantics=("parallel",)),
    )(mx, wqkv, wc, bc, gamma, beta, w1, b1, w2, b2, w3, b3)
    return out


def reference(memory, x, params, n_head):
    """Pure-JAX reference mirroring the PyTorch forward exactly."""
    wq, wk, wv, wc, bc, gamma, beta, w1, b1, w2, b2, w3, b3 = params
    B, N, S = memory.shape
    d = S // n_head
    kv_in = jnp.concatenate([memory, x[:, None, :]], axis=-2)      # (B, N+1, S)
    q = memory @ wq
    k = kv_in @ wk
    v = kv_in @ wv

    def split(t):
        Bq, Nq, _ = t.shape
        return t.reshape(Bq, Nq, n_head, d).transpose(0, 2, 1, 3)  # (B, H, Nq, d)

    qh, kh, vh = split(q), split(k), split(v)
    score = jnp.einsum("bhnd,bhmd->bhnm", qh, kh) / math.sqrt(d)
    score = jax.nn.softmax(score, axis=-1)
    out = jnp.einsum("bhnm,bhmd->bhnd", score, vh)                 # (B, H, N, d)
    out = out.transpose(0, 2, 1, 3).reshape(B, N, S)
    out = out @ wc + bc[0]

    x1 = out + memory
    mean = jnp.mean(x1, axis=-1, keepdims=True)
    var = jnp.mean((x1 - mean) ** 2, axis=-1, keepdims=True)
    xn = (x1 - mean) / jnp.sqrt(var + 1e-5) * gamma[0] + beta[0]

    h1 = jax.nn.relu(xn @ w1 + b1[0])
    h2 = jax.nn.relu(h1 @ w2 + b2[0])
    h3 = h2 @ w3 + b3[0]
    return h3 + xn


if __name__ == "__main__":
    B, N, S, H = 2, 8, 32, 4   # batch, num_memories, size_memory, n_head (MLP depth = 2)
    assert S % H == 0

    key = jax.random.PRNGKey(0)
    keys = jax.random.split(key, 16)

    memory = jax.random.normal(keys[0], (B, N, S), jnp.float32)
    x = jax.random.normal(keys[1], (B, S), jnp.float32)

    def w(k, shape, scale=0.1):
        return scale * jax.random.normal(k, shape, jnp.float32)

    wq = w(keys[2], (S, S))
    wk = w(keys[3], (S, S))
    wv = w(keys[4], (S, S))
    wc = w(keys[5], (S, S))
    bc = w(keys[6], (1, S))
    gamma = jnp.ones((1, S), jnp.float32)   # LayerNorm default init
    beta = jnp.zeros((1, S), jnp.float32)
    w1 = w(keys[7], (S, S))
    b1 = w(keys[8], (1, S))
    w2 = w(keys[9], (S, S))
    b2 = w(keys[10], (1, S))
    w3 = w(keys[11], (S, S))
    b3 = w(keys[12], (1, S))

    params = (wq, wk, wv, wc, bc, gamma, beta, w1, b1, w2, b2, w3, b3)

    out = self_attention_layer(memory, x, params, H)
    out = jax.block_until_ready(out)

    ref = reference(memory, x, params, H)
    assert out.shape == (B, N, S)
    # Everything in the kernel is exact f32 except the EUP approximate reciprocal used
    # for the softmax normalization, hence the slightly relaxed tolerance vs. 1e-4.
    assert jnp.allclose(out, ref, rtol=2e-3, atol=2e-3), (
        float(jnp.max(jnp.abs(out - ref))))

    print("KERNEL_OK")
</pallas_src>

<mosaic_0001>
module attributes {stable_mosaic.version = 11 : i64} {
  func.func @self_attention_layer_kernel(%arg0: i32, %arg1: memref<1x16x32xf32, #tpu.memory_space<vmem>>, %arg2: memref<32x96xf32, #tpu.memory_space<vmem>>, %arg3: memref<32x32xf32, #tpu.memory_space<vmem>>, %arg4: memref<1x32xf32, #tpu.memory_space<vmem>>, %arg5: memref<1x32xf32, #tpu.memory_space<vmem>>, %arg6: memref<1x32xf32, #tpu.memory_space<vmem>>, %arg7: memref<32x32xf32, #tpu.memory_space<vmem>>, %arg8: memref<1x32xf32, #tpu.memory_space<vmem>>, %arg9: memref<32x32xf32, #tpu.memory_space<vmem>>, %arg10: memref<1x32xf32, #tpu.memory_space<vmem>>, %arg11: memref<32x32xf32, #tpu.memory_space<vmem>>, %arg12: memref<1x32xf32, #tpu.memory_space<vmem>>, %arg13: memref<1x8x32xf32, #tpu.memory_space<vmem>>) attributes {dimension_semantics = [#tpu.dimension_semantics<parallel>], iteration_bounds = array<i64: 2>, scalar_prefetch = 0 : i64, scratch_operands = 0 : i64, tpu.core_type = #tpu.core_type<tc>, window_params = [{transform_indices = @transform_0, window_bounds = array<i64: 1, 16, 32>}, {pipeline_mode = #tpu.pipeline_mode<synchronous>, transform_indices = @transform_1, window_bounds = array<i64: 32, 96>}, {pipeline_mode = #tpu.pipeline_mode<synchronous>, transform_indices = @transform_2, window_bounds = array<i64: 32, 32>}, {pipeline_mode = #tpu.pipeline_mode<synchronous>, transform_indices = @transform_3, window_bounds = array<i64: 1, 32>}, {pipeline_mode = #tpu.pipeline_mode<synchronous>, transform_indices = @transform_4, window_bounds = array<i64: 1, 32>}, {pipeline_mode = #tpu.pipeline_mode<synchronous>, transform_indices = @transform_5, window_bounds = array<i64: 1, 32>}, {pipeline_mode = #tpu.pipeline_mode<synchronous>, transform_indices = @transform_6, window_bounds = array<i64: 32, 32>}, {pipeline_mode = #tpu.pipeline_mode<synchronous>, transform_indices = @transform_7, window_bounds = array<i64: 1, 32>}, {pipeline_mode = #tpu.pipeline_mode<synchronous>, transform_indices = @transform_8, window_bounds = array<i64: 32, 32>}, {pipeline_mode = #tpu.pipeline_mode<synchronous>, transform_indices = @transform_9, window_bounds = array<i64: 1, 32>}, {pipeline_mode = #tpu.pipeline_mode<synchronous>, transform_indices = @transform_10, window_bounds = array<i64: 32, 32>}, {pipeline_mode = #tpu.pipeline_mode<synchronous>, transform_indices = @transform_11, window_bounds = array<i64: 1, 32>}, {transform_indices = @transform_12, window_bounds = array<i64: 1, 8, 32>}]} {
    %c0 = arith.constant 0 : index
    %c0_0 = arith.constant 0 : index
    %c0_1 = arith.constant 0 : index
    %0 = vector.load %arg1[%c0, %c0_0, %c0_1] : memref<1x16x32xf32, #tpu.memory_space<vmem>>, vector<1x16x32xf32>
    %1 = vector.shape_cast %0 : vector<1x16x32xf32> to vector<16x32xf32>
    %c0_2 = arith.constant 0 : index
    %c0_3 = arith.constant 0 : index
    %2 = vector.load %arg2[%c0_2, %c0_3] : memref<32x96xf32, #tpu.memory_space<vmem>>, vector<32x96xf32>
    %cst = arith.constant dense<0.000000e+00> : vector<16x96xf32>
    %3 = tpu.matmul %1, %2, %cst {dimension_numbers = #tpu.dot_dimension_numbers<[1], [0], [0], [1], [0, 0, 1, 1], [], []>} : vector<16x32xf32>, vector<32x96xf32>, vector<16x96xf32> -> vector<16x96xf32>
    %4 = vector.shape_cast %3 : vector<16x96xf32> to vector<1x16x96xf32>
    %5 = vector.extract_strided_slice %4 {offsets = [0, 0, 0], sizes = [1, 8, 32], strides = [1, 1, 1]} : vector<1x16x96xf32> to vector<1x8x32xf32>
    %6 = vector.extract_strided_slice %4 {offsets = [0, 0, 32], sizes = [1, 9, 32], strides = [1, 1, 1]} : vector<1x16x96xf32> to vector<1x9x32xf32>
    %7 = vector.extract_strided_slice %4 {offsets = [0, 0, 64], sizes = [1, 9, 32], strides = [1, 1, 1]} : vector<1x16x96xf32> to vector<1x9x32xf32>
    %8 = vector.extract_strided_slice %5 {offsets = [0, 0, 0], sizes = [1, 8, 8], strides = [1, 1, 1]} : vector<1x8x32xf32> to vector<1x8x8xf32>
    %9 = vector.extract_strided_slice %6 {offsets = [0, 0, 0], sizes = [1, 9, 8], strides = [1, 1, 1]} : vector<1x9x32xf32> to vector<1x9x8xf32>
    %10 = vector.extract_strided_slice %7 {offsets = [0, 0, 0], sizes = [1, 9, 8], strides = [1, 1, 1]} : vector<1x9x32xf32> to vector<1x9x8xf32>
    "tpu.trace_start"() <{level = 10 : i32, message = "bnd,bmd->bnm"}> : () -> ()
    %cst_4 = arith.constant dense<0.000000e+00> : vector<1x8x9xf32>
    %11 = tpu.matmul %8, %9, %cst_4 {dimension_numbers = #tpu.dot_dimension_numbers<[2], [2], [1], [1], [0, 0, 0, 1, 1, 1], [0], [0]>} : vector<1x8x8xf32>, vector<1x9x8xf32>, vector<1x8x9xf32> -> vector<1x8x9xf32>
    "tpu.trace_stop"() : () -> ()
    %cst_5 = arith.constant dense<0xFF800000> : vector<1x8xf32>
    %12 = vector.multi_reduction <maximumf>, %11, %cst_5 [2] : vector<1x8x9xf32> to vector<1x8xf32>
    %13 = vector.shape_cast %12 : vector<1x8xf32> to vector<1x8x1xf32>
    %14 = vector.broadcast %13 : vector<1x8x1xf32> to vector<1x8x9xf32>
    %15 = arith.subf %11, %14 : vector<1x8x9xf32>
    %16 = math.exp %15 : vector<1x8x9xf32>
    %cst_6 = arith.constant dense<0.000000e+00> : vector<1x8xf32>
    %17 = vector.multi_reduction <add>, %16, %cst_6 [2] : vector<1x8x9xf32> to vector<1x8xf32>
    %18 = vector.shape_cast %17 : vector<1x8xf32> to vector<1x8x1xf32>
    %19 = tpu.reciprocal %18 {approx = true} : vector<1x8x1xf32> -> vector<1x8x1xf32>
    %20 = vector.broadcast %19 : vector<1x8x1xf32> to vector<1x8x9xf32>
    %21 = arith.mulf %16, %20 : vector<1x8x9xf32>
    "tpu.trace_start"() <{level = 10 : i32, message = "bnm,bmd->bnd"}> : () -> ()
    %cst_7 = arith.constant dense<0.000000e+00> : vector<1x8x8xf32>
    %22 = tpu.matmul %21, %10, %cst_7 {dimension_numbers = #tpu.dot_dimension_numbers<[2], [1], [1], [2], [0, 0, 0, 1, 1, 2], [0], [0]>} : vector<1x8x9xf32>, vector<1x9x8xf32>, vector<1x8x8xf32> -> vector<1x8x8xf32>
    "tpu.trace_stop"() : () -> ()
    %23 = vector.extract_strided_slice %5 {offsets = [0, 0, 8], sizes = [1, 8, 8], strides = [1, 1, 1]} : vector<1x8x32xf32> to vector<1x8x8xf32>
    %24 = vector.extract_strided_slice %6 {offsets = [0, 0, 8], sizes = [1, 9, 8], strides = [1, 1, 1]} : vector<1x9x32xf32> to vector<1x9x8xf32>
    %25 = vector.extract_strided_slice %7 {offsets = [0, 0, 8], sizes = [1, 9, 8], strides = [1, 1, 1]} : vector<1x9x32xf32> to vector<1x9x8xf32>
    "tpu.trace_start"() <{level = 10 : i32, message = "bnd,bmd->bnm"}> : () -> ()
    %cst_8 = arith.constant dense<0.000000e+00> : vector<1x8x9xf32>
    %26 = tpu.matmul %23, %24, %cst_8 {dimension_numbers = #tpu.dot_dimension_numbers<[2], [2], [1], [1], [0, 0, 0, 1, 1, 1], [0], [0]>} : vector<1x8x8xf32>, vector<1x9x8xf32>, vector<1x8x9xf32> -> vector<1x8x9xf32>
    "tpu.trace_stop"() : () -> ()
    %cst_9 = arith.constant dense<0xFF800000> : vector<1x8xf32>
    %27 = vector.multi_reduction <maximumf>, %26, %cst_9 [2] : vector<1x8x9xf32> to vector<1x8xf32>
    %28 = vector.shape_cast %27 : vector<1x8xf32> to vector<1x8x1xf32>
    %29 = vector.broadcast %28 : vector<1x8x1xf32> to vector<1x8x9xf32>
    %30 = arith.subf %26, %29 : vector<1x8x9xf32>
    %31 = math.exp %30 : vector<1x8x9xf32>
    %cst_10 = arith.constant dense<0.000000e+00> : vector<1x8xf32>
    %32 = vector.multi_reduction <add>, %31, %cst_10 [2] : vector<1x8x9xf32> to vector<1x8xf32>
    %33 = vector.shape_cast %32 : vector<1x8xf32> to vector<1x8x1xf32>
    %34 = tpu.reciprocal %33 {approx = true} : vector<1x8x1xf32> -> vector<1x8x1xf32>
    %35 = vector.broadcast %34 : vector<1x8x1xf32> to vector<1x8x9xf32>
    %36 = arith.mulf %31, %35 : vector<1x8x9xf32>
    "tpu.trace_start"() <{level = 10 : i32, message = "bnm,bmd->bnd"}> : () -> ()
    %cst_11 = arith.constant dense<0.000000e+00> : vector<1x8x8xf32>
    %37 = tpu.matmul %36, %25, %cst_11 {dimension_numbers = #tpu.dot_dimension_numbers<[2], [1], [1], [2], [0, 0, 0, 1, 1, 2], [0], [0]>} : vector<1x8x9xf32>, vector<1x9x8xf32>, vector<1x8x8xf32> -> vector<1x8x8xf32>
    "tpu.trace_stop"() : () -> ()
    %38 = vector.extract_strided_slice %5 {offsets = [0, 0, 16], sizes = [1, 8, 8], strides = [1, 1, 1]} : vector<1x8x32xf32> to vector<1x8x8xf32>
    %39 = vector.extract_strided_slice %6 {offsets = [0, 0, 16], sizes = [1, 9, 8], strides = [1, 1, 1]} : vector<1x9x32xf32> to vector<1x9x8xf32>
    %40 = vector.extract_strided_slice %7 {offsets = [0, 0, 16], sizes = [1, 9, 8], strides = [1, 1, 1]} : vector<1x9x32xf32> to vector<1x9x8xf32>
    "tpu.trace_start"() <{level = 10 : i32, message = "bnd,bmd->bnm"}> : () -> ()
    %cst_12 = arith.constant dense<0.000000e+00> : vector<1x8x9xf32>
    %41 = tpu.matmul %38, %39, %cst_12 {dimension_numbers = #tpu.dot_dimension_numbers<[2], [2], [1], [1], [0, 0, 0, 1, 1, 1], [0], [0]>} : vector<1x8x8xf32>, vector<1x9x8xf32>, vector<1x8x9xf32> -> vector<1x8x9xf32>
    "tpu.trace_stop"() : () -> ()
    %cst_13 = arith.constant dense<0xFF800000> : vector<1x8xf32>
    %42 = vector.multi_reduction <maximumf>, %41, %cst_13 [2] : vector<1x8x9xf32> to vector<1x8xf32>
    %43 = vector.shape_cast %42 : vector<1x8xf32> to vector<1x8x1xf32>
    %44 = vector.broadcast %43 : vector<1x8x1xf32> to vector<1x8x9xf32>
    %45 = arith.subf %41, %44 : vector<1x8x9xf32>
    %46 = math.exp %45 : vector<1x8x9xf32>
    %cst_14 = arith.constant dense<0.000000e+00> : vector<1x8xf32>
    %47 = vector.multi_reduction <add>, %46, %cst_14 [2] : vector<1x8x9xf32> to vector<1x8xf32>
    %48 = vector.shape_cast %47 : vector<1x8xf32> to vector<1x8x1xf32>
    %49 = tpu.reciprocal %48 {approx = true} : vector<1x8x1xf32> -> vector<1x8x1xf32>
    %50 = vector.broadcast %49 : vector<1x8x1xf32> to vector<1x8x9xf32>
    %51 = arith.mulf %46, %50 : vector<1x8x9xf32>
    "tpu.trace_start"() <{level = 10 : i32, message = "bnm,bmd->bnd"}> : () -> ()
    %cst_15 = arith.constant dense<0.000000e+00> : vector<1x8x8xf32>
    %52 = tpu.matmul %51, %40, %cst_15 {dimension_numbers = #tpu.dot_dimension_numbers<[2], [1], [1], [2], [0, 0, 0, 1, 1, 2], [0], [0]>} : vector<1x8x9xf32>, vector<1x9x8xf32>, vector<1x8x8xf32> -> vector<1x8x8xf32>
    "tpu.trace_stop"() : () -> ()
    %53 = vector.extract_strided_slice %5 {offsets = [0, 0, 24], sizes = [1, 8, 8], strides = [1, 1, 1]} : vector<1x8x32xf32> to vector<1x8x8xf32>
    %54 = vector.extract_strided_slice %6 {offsets = [0, 0, 24], sizes = [1, 9, 8], strides = [1, 1, 1]} : vector<1x9x32xf32> to vector<1x9x8xf32>
    %55 = vector.extract_strided_slice %7 {offsets = [0, 0, 24], sizes = [1, 9, 8], strides = [1, 1, 1]} : vector<1x9x32xf32> to vector<1x9x8xf32>
    "tpu.trace_start"() <{level = 10 : i32, message = "bnd,bmd->bnm"}> : () -> ()
    %cst_16 = arith.constant dense<0.000000e+00> : vector<1x8x9xf32>
    %56 = tpu.matmul %53, %54, %cst_16 {dimension_numbers = #tpu.dot_dimension_numbers<[2], [2], [1], [1], [0, 0, 0, 1, 1, 1], [0], [0]>} : vector<1x8x8xf32>, vector<1x9x8xf32>, vector<1x8x9xf32> -> vector<1x8x9xf32>
    "tpu.trace_stop"() : () -> ()
    %cst_17 = arith.constant dense<0xFF800000> : vector<1x8xf32>
    %57 = vector.multi_reduction <maximumf>, %56, %cst_17 [2] : vector<1x8x9xf32> to vector<1x8xf32>
    %58 = vector.shape_cast %57 : vector<1x8xf32> to vector<1x8x1xf32>
    %59 = vector.broadcast %58 : vector<1x8x1xf32> to vector<1x8x9xf32>
    %60 = arith.subf %56, %59 : vector<1x8x9xf32>
    %61 = math.exp %60 : vector<1x8x9xf32>
    %cst_18 = arith.constant dense<0.000000e+00> : vector<1x8xf32>
    %62 = vector.multi_reduction <add>, %61, %cst_18 [2] : vector<1x8x9xf32> to vector<1x8xf32>
    %63 = vector.shape_cast %62 : vector<1x8xf32> to vector<1x8x1xf32>
    %64 = tpu.reciprocal %63 {approx = true} : vector<1x8x1xf32> -> vector<1x8x1xf32>
    %65 = vector.broadcast %64 : vector<1x8x1xf32> to vector<1x8x9xf32>
    %66 = arith.mulf %61, %65 : vector<1x8x9xf32>
    "tpu.trace_start"() <{level = 10 : i32, message = "bnm,bmd->bnd"}> : () -> ()
    %cst_19 = arith.constant dense<0.000000e+00> : vector<1x8x8xf32>
    %67 = tpu.matmul %66, %55, %cst_19 {dimension_numbers = #tpu.dot_dimension_numbers<[2], [1], [1], [2], [0, 0, 0, 1, 1, 2], [0], [0]>} : vector<1x8x9xf32>, vector<1x9x8xf32>, vector<1x8x8xf32> -> vector<1x8x8xf32>
    "tpu.trace_stop"() : () -> ()
    %68 = tpu.concatenate %22, %37, %52, %67 in 2 : vector<1x8x8xf32>, vector<1x8x8xf32>, vector<1x8x8xf32>, vector<1x8x8xf32> -> vector<1x8x32xf32>
    %69 = vector.shape_cast %68 : vector<1x8x32xf32> to vector<8x32xf32>
    %70 = vector.extract_strided_slice %0 {offsets = [0, 0, 0], sizes = [1, 8, 32], strides = [1, 1, 1]} : vector<1x16x32xf32> to vector<1x8x32xf32>
    %71 = vector.shape_cast %70 : vector<1x8x32xf32> to vector<8x32xf32>
    %c0_20 = arith.constant 0 : index
    %c0_21 = arith.constant 0 : index
    %72 = vector.load %arg3[%c0_20, %c0_21] : memref<32x32xf32, #tpu.memory_space<vmem>>, vector<32x32xf32>
    %cst_22 = arith.constant dense<0.000000e+00> : vector<8x32xf32>
    %73 = tpu.matmul %69, %72, %cst_22 {dimension_numbers = #tpu.dot_dimension_numbers<[1], [0], [0], [1], [0, 0, 1, 1], [], []>} : vector<8x32xf32>, vector<32x32xf32>, vector<8x32xf32> -> vector<8x32xf32>
    %c0_23 = arith.constant 0 : index
    %c0_24 = arith.constant 0 : index
    %74 = vector.load %arg4[%c0_23, %c0_24] : memref<1x32xf32, #tpu.memory_space<vmem>>, vector<1x32xf32>
    %75 = vector.broadcast %74 : vector<1x32xf32> to vector<8x32xf32>
    %76 = arith.addf %73, %75 : vector<8x32xf32>
    %77 = arith.addf %76, %71 : vector<8x32xf32>
    %cst_25 = arith.constant dense<0.000000e+00> : vector<8xf32>
    %78 = vector.multi_reduction <add>, %77, %cst_25 [1] : vector<8x32xf32> to vector<8xf32>
    %79 = vector.shape_cast %78 : vector<8xf32> to vector<8x1xf32>
    %cst_26 = arith.constant 3.200000e+01 : f32
    %80 = vector.broadcast %cst_26 : f32 to vector<8x1xf32>
    %81 = arith.divf %79, %80 : vector<8x1xf32>
    %82 = vector.broadcast %81 : vector<8x1xf32> to vector<8x32xf32>
    %83 = arith.subf %77, %82 : vector<8x32xf32>
    %84 = arith.mulf %83, %83 : vector<8x32xf32>
    %cst_27 = arith.constant dense<0.000000e+00> : vector<8xf32>
    %85 = vector.multi_reduction <add>, %84, %cst_27 [1] : vector<8x32xf32> to vector<8xf32>
    %86 = vector.shape_cast %85 : vector<8xf32> to vector<8x1xf32>
    %cst_28 = arith.constant 3.200000e+01 : f32
    %87 = vector.broadcast %cst_28 : f32 to vector<8x1xf32>
    %88 = arith.divf %86, %87 : vector<8x1xf32>
    %89 = vector.broadcast %81 : vector<8x1xf32> to vector<8x32xf32>
    %90 = arith.subf %77, %89 : vector<8x32xf32>
    %cst_29 = arith.constant 9.99999974E-6 : f32
    %91 = vector.broadcast %cst_29 : f32 to vector<8x1xf32>
    %92 = arith.addf %88, %91 : vector<8x1xf32>
    %93 = math.rsqrt %92 : vector<8x1xf32>
    %94 = vector.broadcast %93 : vector<8x1xf32> to vector<8x32xf32>
    %95 = arith.mulf %90, %94 : vector<8x32xf32>
    %c0_30 = arith.constant 0 : index
    %c0_31 = arith.constant 0 : index
    %96 = vector.load %arg5[%c0_30, %c0_31] : memref<1x32xf32, #tpu.memory_space<vmem>>, vector<1x32xf32>
    %97 = vector.broadcast %96 : vector<1x32xf32> to vector<8x32xf32>
    %98 = arith.mulf %95, %97 : vector<8x32xf32>
    %c0_32 = arith.constant 0 : index
    %c0_33 = arith.constant 0 : index
    %99 = vector.load %arg6[%c0_32, %c0_33] : memref<1x32xf32, #tpu.memory_space<vmem>>, vector<1x32xf32>
    %100 = vector.broadcast %99 : vector<1x32xf32> to vector<8x32xf32>
    %101 = arith.addf %98, %100 : vector<8x32xf32>
    %c0_34 = arith.constant 0 : index
    %c0_35 = arith.constant 0 : index
    %102 = vector.load %arg7[%c0_34, %c0_35] : memref<32x32xf32, #tpu.memory_space<vmem>>, vector<32x32xf32>
    %cst_36 = arith.constant dense<0.000000e+00> : vector<8x32xf32>
    %103 = tpu.matmul %101, %102, %cst_36 {dimension_numbers = #tpu.dot_dimension_numbers<[1], [0], [0], [1], [0, 0, 1, 1], [], []>} : vector<8x32xf32>, vector<32x32xf32>, vector<8x32xf32> -> vector<8x32xf32>
    %c0_37 = arith.constant 0 : index
    %c0_38 = arith.constant 0 : index
    %104 = vector.load %arg8[%c0_37, %c0_38] : memref<1x32xf32, #tpu.memory_space<vmem>>, vector<1x32xf32>
    %105 = vector.broadcast %104 : vector<1x32xf32> to vector<8x32xf32>
    %106 = arith.addf %103, %105 : vector<8x32xf32>
    %cst_39 = arith.constant 0.000000e+00 : f32
    %107 = vector.broadcast %cst_39 : f32 to vector<8x32xf32>
    %108 = arith.maximumf %106, %107 : vector<8x32xf32>
    %c0_40 = arith.constant 0 : index
    %c0_41 = arith.constant 0 : index
    %109 = vector.load %arg9[%c0_40, %c0_41] : memref<32x32xf32, #tpu.memory_space<vmem>>, vector<32x32xf32>
    %cst_42 = arith.constant dense<0.000000e+00> : vector<8x32xf32>
    %110 = tpu.matmul %108, %109, %cst_42 {dimension_numbers = #tpu.dot_dimension_numbers<[1], [0], [0], [1], [0, 0, 1, 1], [], []>} : vector<8x32xf32>, vector<32x32xf32>, vector<8x32xf32> -> vector<8x32xf32>
    %c0_43 = arith.constant 0 : index
    %c0_44 = arith.constant 0 : index
    %111 = vector.load %arg10[%c0_43, %c0_44] : memref<1x32xf32, #tpu.memory_space<vmem>>, vector<1x32xf32>
    %112 = vector.broadcast %111 : vector<1x32xf32> to vector<8x32xf32>
    %113 = arith.addf %110, %112 : vector<8x32xf32>
    %cst_45 = arith.constant 0.000000e+00 : f32
    %114 = vector.broadcast %cst_45 : f32 to vector<8x32xf32>
    %115 = arith.maximumf %113, %114 : vector<8x32xf32>
    %c0_46 = arith.constant 0 : index
    %c0_47 = arith.constant 0 : index
    %116 = vector.load %arg11[%c0_46, %c0_47] : memref<32x32xf32, #tpu.memory_space<vmem>>, vector<32x32xf32>
    %cst_48 = arith.constant dense<0.000000e+00> : vector<8x32xf32>
    %117 = tpu.matmul %115, %116, %cst_48 {dimension_numbers = #tpu.dot_dimension_numbers<[1], [0], [0], [1], [0, 0, 1, 1], [], []>} : vector<8x32xf32>, vector<32x32xf32>, vector<8x32xf32> -> vector<8x32xf32>
    %c0_49 = arith.constant 0 : index
    %c0_50 = arith.constant 0 : index
    %118 = vector.load %arg12[%c0_49, %c0_50] : memref<1x32xf32, #tpu.memory_space<vmem>>, vector<1x32xf32>
    %119 = vector.broadcast %118 : vector<1x32xf32> to vector<8x32xf32>
    %120 = arith.addf %117, %119 : vector<8x32xf32>
    %121 = arith.addf %120, %101 : vector<8x32xf32>
    %122 = vector.shape_cast %121 : vector<8x32xf32> to vector<1x8x32xf32>
    %c0_51 = arith.constant 0 : index
    %c0_52 = arith.constant 0 : index
    %c0_53 = arith.constant 0 : index
    %123 = vector.load %arg13[%c0_51, %c0_52, %c0_53] : memref<1x8x32xf32, #tpu.memory_space<vmem>>, vector<1x8x32xf32>
    tpu.vector_store %arg13[%c0_51, %c0_52, %c0_53], %122 {strides = array<i32>} : memref<1x8x32xf32, #tpu.memory_space<vmem>>, vector<1x8x32xf32>,
    return
  }
  func.func @transform_0(%arg0: i32) -> (i32, i32, i32) {
    %c0_i32 = arith.constant 0 : i32
    %c0_i32_0 = arith.constant 0 : i32
    %c0_i32_1 = arith.constant 0 : i32
    return %arg0, %c0_i32, %c0_i32_0 : i32, i32, i32
  }
  func.func @transform_1(%arg0: i32) -> (i32, i32) {
    %c0_i32 = arith.constant 0 : i32
    %c0_i32_0 = arith.constant 0 : i32
    %c0_i32_1 = arith.constant 0 : i32
    return %c0_i32, %c0_i32_0 : i32, i32
  }
  func.func @transform_2(%arg0: i32) -> (i32, i32) {
    %c0_i32 = arith.constant 0 : i32
    %c0_i32_0 = arith.constant 0 : i32
    %c0_i32_1 = arith.constant 0 : i32
    return %c0_i32, %c0_i32_0 : i32, i32
  }
  func.func @transform_3(%arg0: i32) -> (i32, i32) {
    %c0_i32 = arith.constant 0 : i32
    %c0_i32_0 = arith.constant 0 : i32
    %c0_i32_1 = arith.constant 0 : i32
    return %c0_i32, %c0_i32_0 : i32, i32
  }
  func.func @transform_4(%arg0: i32) -> (i32, i32) {
    %c0_i32 = arith.constant 0 : i32
    %c0_i32_0 = arith.constant 0 : i32
    %c0_i32_1 = arith.constant 0 : i32
    return %c0_i32, %c0_i32_0 : i32, i32
  }
  func.func @transform_5(%arg0: i32) -> (i32, i32) {
    %c0_i32 = arith.constant 0 : i32
    %c0_i32_0 = arith.constant 0 : i32
    %c0_i32_1 = arith.constant 0 : i32
    return %c0_i32, %c0_i32_0 : i32, i32
  }
  func.func @transform_6(%arg0: i32) -> (i32, i32) {
    %c0_i32 = arith.constant 0 : i32
    %c0_i32_0 = arith.constant 0 : i32
    %c0_i32_1 = arith.constant 0 : i32
    return %c0_i32, %c0_i32_0 : i32, i32
  }
  func.func @transform_7(%arg0: i32) -> (i32, i32) {
    %c0_i32 = arith.constant 0 : i32
    %c0_i32_0 = arith.constant 0 : i32
    %c0_i32_1 = arith.constant 0 : i32
    return %c0_i32, %c0_i32_0 : i32, i32
  }
  func.func @transform_8(%arg0: i32) -> (i32, i32) {
    %c0_i32 = arith.constant 0 : i32
    %c0_i32_0 = arith.constant 0 : i32
    %c0_i32_1 = arith.constant 0 : i32
    return %c0_i32, %c0_i32_0 : i32, i32
  }
  func.func @transform_9(%arg0: i32) -> (i32, i32) {
    %c0_i32 = arith.constant 0 : i32
    %c0_i32_0 = arith.constant 0 : i32
    %c0_i32_1 = arith.constant 0 : i32
    return %c0_i32, %c0_i32_0 : i32, i32
  }
  func.func @transform_10(%arg0: i32) -> (i32, i32) {
    %c0_i32 = arith.constant 0 : i32
    %c0_i32_0 = arith.constant 0 : i32
    %c0_i32_1 = arith.constant 0 : i32
    return %c0_i32, %c0_i32_0 : i32, i32
  }
  func.func @transform_11(%arg0: i32) -> (i32, i32) {
    %c0_i32 = arith.constant 0 : i32
    %c0_i32_0 = arith.constant 0 : i32
    %c0_i32_1 = arith.constant 0 : i32
    return %c0_i32, %c0_i32_0 : i32, i32
  }
  func.func @transform_12(%arg0: i32) -> (i32, i32, i32) {
    %c0_i32 = arith.constant 0 : i32
    %c0_i32_0 = arith.constant 0 : i32
    %c0_i32_1 = arith.constant 0 : i32
    return %arg0, %c0_i32, %c0_i32_0 : i32, i32, i32
  }
}

</mosaic_0001>

<bundles_post_ra>
// kernel: tpu_custom_call.1
= control target key start
LH: loop header
LB: loop body
LE: loop exit
PB: predicated region body
PF: predicated region fallthrough
CT: control target
= control target key end

     0   :  { %s2976_s0 = inlined_call_operand.hbm [shape: f32[2,16,32], index: 0, kind: input, shape index: {}]   ;;  %s2977_s1 = inlined_call_operand.hbm [shape: f32[32,96], index: 1, kind: input, shape index: {}]   ;;  %s2978_s2 = inlined_call_operand.hbm [shape: f32[32,32], index: 2, kind: input, shape index: {}]   ;;  %s2979_s3 = inlined_call_operand.vmem [shape: f32[1,32], index: 3, kind: input, shape index: {}]   ;;  %s2980_s4 = inlined_call_operand.vmem [shape: f32[1,32], index: 4, kind: input, shape index: {}]   ;;  %s2981_s5 = inlined_call_operand.vmem [shape: f32[1,32], index: 5, kind: input, shape index: {}]   ;;  %s2982_s6 = inlined_call_operand.hbm [shape: f32[32,32], index: 6, kind: input, shape index: {}]   ;;  %s2983_s7 = inlined_call_operand.vmem [shape: f32[1,32], index: 7, kind: input, shape index: {}]   ;;  %s2984_s8 = inlined_call_operand.hbm [shape: f32[32,32], index: 8, kind: input, shape index: {}]   ;;  %s2985_s9 = inlined_call_operand.vmem [shape: f32[1,32], index: 9, kind: input, shape index: {}]   ;;  %s2986_s10 = inlined_call_operand.vmem [shape: f32[32,32], index: 10, kind: input, shape index: {}]   ;;  %s2987_s11 = inlined_call_operand.vmem [shape: f32[1,32], index: 11, kind: input, shape index: {}]   ;;  %s2988_s12 = inlined_call_operand.hbm [shape: f32[2,8,32], index: 12, kind: output, shape index: {}]  }
   0x1   :  { %2995 = sst [smem:[#allocation18_spill]] %s2983_s7 }
   0x2   :  { %2996 = sst [smem:[#allocation19_spill]] %s2985_s9 }
   0x3   :  { %2997 = sst [smem:[#allocation20_spill]] %s2987_s11 }
   0x4   :  { %2998 = sst [smem:[#allocation21_spill]] %s2988_s12 }
   0x5   :  { %17 = vsyncpa [#allocation3], 0 }
   0x6   :  { %19 = vsyncpa [#allocation3 + $0x1], 0 }
   0x7   :  { %20 = vsyncpa [#allocation6], 0 }
   0x8   :  { %21 = vsyncpa [#allocation9], 0 }
   0x9   :  { %22 = vsyncpa [#allocation4], 0 }
   0xa   :  { %24 = vsyncpa [#allocation4 + $0x1], 0  ;;  %s2536_s21 = smov 0   ;;  %s2538_s22 = smov 0  }
   0xb   :  { %s2540_s23 = smov 0   ;;  %s2542_s24 = smov 0  }
   0xc LB: > { %2999 = sst [smem:[#allocation16_spill]] %s2431_s21  ;;  %s2557_s25 = sadd.s32 4294967295, %s2443_s24   ;;  %s2443_s24 = sphi %s2542_s24, %s3031_s24   ;;  %s2439_s23 = sphi %s2540_s23, %s3030_s23   ;;  %s2435_s22 = sphi %s2538_s22, %s3029_s22   ;;  %s2431_s21 = sphi %s2536_s21, %s3028_s21  }
   0xd   : > { %s1783_s26 = sadd.s32 4294967294, %s2443_s24   ;;  %p50_p0 = scmp.ne.s32.totalorder %s2435_s22, %s2431_s21 }
   0xe   : > { %p2991_p1 = scmp.eq.s32.totalorder %s2557_s25, 0  ;;  %p311_p3 = scmp.eq.s32.totalorder %s1783_s26, 1 }
   0xf   : > { %p1784_p5 = scmp.ge.s32.totalorder %s2443_s24, 1  ;;  %p318_p7 = scmp.lt.s32.totalorder %s2443_s24, 3 }
  0x10   : > { %p2566_p4 = por %p2991_p1, %p50_p0  ;;  %p2571_p6 = por %p311_p3, %p50_p0 }
  0x11   : > { %p2576_p8 = pnand %p1784_p5, %p318_p7  ;;  %s2445_s30 = smov [#allocation5]  }
  0x12   : > { %s3000_s27 = scalar_select %p2566_p4, 1, 0 }
  0x13   : > { %s3001_s28 = scalar_select %p2571_p6, 1, 0 }
  0x14   : > { %s3003_s29 = scalar_select %p2576_p8, 1, 0 }
  0x15   : > { %3002 = sst [smem:[#allocation17_spill]] %s3001_s28  ;;  %s330_s13 = sshll.u32 %s2445_s30, 4  ;;  %s2580_s13 = int_to_ptr.vmem [resolvable:$true] %s330_s13 }
  0x16   : > { %p2082_p9 = pneg %p2576_p8  ;;  %s2446_s15 = smov [#allocation8]  }
  0x17   : > { %s365_s16 = sshll.u32 %s2446_s15, 4  ;;  %s2447_s17 = smov [#allocation7]   ;;  %s2591_s16 = int_to_ptr.vmem [resolvable:$true] %s365_s16 }
  0x18   : > { %p2587_p11 = pnand %p2082_p9, %p2991_p1  ;;  %s2593_s18 = sshll.u32 %s2447_s17, 4  ;;  %s344_s18 = int_to_ptr.vmem [resolvable:$true] %s2593_s18 }
  0x19   : > { %s2227_s26 = scalar_lea.hbm %s2977_s1, 512 }
  0x1a   : > { %p2228_p12 = scmp.ne.s32.totalorder %s2977_s1, %s2227_s26  ;;  %p2603_p13 = pneg %p2587_p11 }
  0x1b   : > { %p2234_p5 = scmp.lt.u32.totalorder %s2227_s26, %s2977_s1 }
  0x1c   : > { %p2230_p0 = pnand %p2603_p13, %p2228_p12 }
  0x1e   : > { %p2231_p3 = pneg %p2230_p0 }
  0x20   : > { %p2236_p7 = pnand %p2234_p5, %p2231_p3 }
  0x22   : > { %2239 = shalt.err (!%p2236_p7)
}
  0x23   : > { %s2240_s28 = scalar_lea.vmem %s2580_s13, 512  ;;  %p2248_p2 = scmp.lt.s32.totalorder %s2580_s13, %s2580_s13 }
  0x24   : > { %p2241_p9 = scmp.ne.s32.totalorder %s2580_s13, %s2240_s28  ;;  %p2249_p6 = scmp.lt.s32.totalorder %s2240_s28, %s2240_s28 }
  0x26   : > { %p2243_p10 = pnand %p2241_p9, %p2603_p13  ;;  %p2250_p12 = por %p2249_p6, %p2248_p2 }
  0x28   : > { %p2244_p1 = pneg %p2243_p10 }
  0x2a   : > { %p2251_p0 = pnand %p2250_p12, %p2244_p1 }
  0x2c   : > { %2254 = shalt.err (!%p2251_p0)
}
  0x2d   : > { %s2448_s19 = smov 128   ;;  %s2449_s20 = smov 8  }
  0x2e   : > { %2085 = dma.hbm_to_vmem [thread:$0]  (!%p2587_p11), %s2977_s1, 512, %s2580_s13, [#allocation6], %s2448_s19, %s2448_s19, %s2449_s20  }
  0x2f   : > { %s2255_s28 = scalar_lea.hbm %s2982_s6, 512 }
  0x30   : > { %p2256_p1 = scmp.ne.s32.totalorder %s2982_s6, %s2255_s28  ;;  %p2262_p10 = scmp.lt.u32.totalorder %s2255_s28, %s2982_s6 }
  0x32   : > { %p2258_p2 = pnand %p2256_p1, %p2603_p13 }
  0x34   : > { %p2259_p6 = pneg %p2258_p2 }
  0x36   : > { %p2264_p3 = pnand %p2262_p10, %p2259_p6 }
  0x38   : > { %2267 = shalt.err (!%p2264_p3)
}
  0x39   : > { %s2268_s13 = scalar_lea.vmem %s2591_s16, 512  ;;  %p2276_p12 = scmp.lt.s32.totalorder %s2591_s16, %s2591_s16 }
  0x3a   : > { %p2269_p5 = scmp.ne.s32.totalorder %s2591_s16, %s2268_s13  ;;  %p2277_p0 = scmp.lt.s32.totalorder %s2268_s13, %s2268_s13 }
  0x3c   : > { %p2271_p7 = pnand %p2269_p5, %p2603_p13  ;;  %p2278_p1 = por %p2277_p0, %p2276_p12 }
  0x3e   : > { %p2272_p9 = pneg %p2271_p7 }
  0x40   : > { %p2279_p2 = pnand %p2278_p1, %p2272_p9 }
  0x42   : > { %2282 = shalt.err (!%p2279_p2)
}
  0x43   : > { %2091 = dma.hbm_to_vmem [thread:$0]  (!%p2587_p11), %s2982_s6, 512, %s2591_s16, [#allocation9], %s2448_s19, %s2448_s19, %s2449_s20  }
  0x44   : > { %s2283_s26 = scalar_lea.hbm %s2978_s2, 512 }
  0x45   : > { %p2284_p6 = scmp.ne.s32.totalorder %s2978_s2, %s2283_s26  ;;  %p2290_p5 = scmp.lt.u32.totalorder %s2283_s26, %s2978_s2 }
  0x47   : > { %p2286_p10 = pnand %p2284_p6, %p2603_p13 }
  0x49   : > { %p2287_p3 = pneg %p2286_p10 }
  0x4b   : > { %p2292_p7 = pnand %p2290_p5, %p2287_p3 }
  0x4d   : > { %2295 = shalt.err (!%p2292_p7)
}
  0x4e   : > { %s2296_s13 = scalar_lea.vmem %s344_s18, 512  ;;  %p2304_p1 = scmp.lt.s32.totalorder %s344_s18, %s344_s18 }
  0x4f   : > { %p2297_p9 = scmp.ne.s32.totalorder %s344_s18, %s2296_s13  ;;  %p2305_p2 = scmp.lt.s32.totalorder %s2296_s13, %s2296_s13 }
  0x51   : > { %p2299_p12 = pnand %p2297_p9, %p2603_p13  ;;  %p2306_p4 = por %p2305_p2, %p2304_p1 }
  0x53   : > { %p2300_p0 = pneg %p2299_p12 }
  0x55   : > { %p2307_p8 = pnand %p2306_p4, %p2300_p0 }
  0x57   : > { %2310 = shalt.err (!%p2307_p8)
}
  0x58   : > { %2088 = dma.hbm_to_vmem [thread:$0]  (!%p2587_p11), %s2978_s2, 512, %s344_s18, [#allocation6], %s2448_s19, %s2448_s19, %s2449_s20  }
  0x59   : > { %s2450_s9 = smov [#allocation10]   ;;  %s2311_s30 = scalar_lea.hbm %s2984_s8, 512 }
  0x5a   : > { %s381_s11 = sshll.u32 %s2450_s9, 4  ;;  %p2312_p4 = scmp.ne.s32.totalorder %s2984_s8, %s2311_s30  ;;  %s382_s11 = int_to_ptr.vmem [resolvable:$true] %s381_s11 }
  0x5b   : > { %p2318_p10 = scmp.lt.u32.totalorder %s2311_s30, %s2984_s8 }
  0x5c   : > { %p2314_p8 = pnand %p2312_p4, %p2603_p13 }
  0x5e   : > { %p2315_p6 = pneg %p2314_p8 }
  0x60   : > { %p2320_p3 = pnand %p2318_p10, %p2315_p6 }
  0x62   : > { %2323 = shalt.err (!%p2320_p3)
}
  0x63   : > { %s2324_s18 = scalar_lea.vmem %s382_s11, 512  ;;  %p2332_p12 = scmp.lt.s32.totalorder %s382_s11, %s382_s11 }
  0x64   : > { %p2325_p5 = scmp.ne.s32.totalorder %s382_s11, %s2324_s18  ;;  %p2333_p0 = scmp.lt.s32.totalorder %s2324_s18, %s2324_s18 }
  0x66   : > { %p2327_p7 = pnand %p2325_p5, %p2603_p13  ;;  %p2334_p1 = por %p2333_p0, %p2332_p12 }
  0x68   : > { %p2328_p9 = pneg %p2327_p7 }
  0x6a   : > { %p2335_p2 = pnand %p2334_p1, %p2328_p9 }
  0x6c   : > { %2338 = shalt.err (!%p2335_p2)
}
  0x6d   : > { %2094 = dma.hbm_to_vmem [thread:$0]  (!%p2587_p11), %s2984_s8, 512, %s382_s11, [#allocation9], %s2448_s19, %s2448_s19, %s2449_s20  }
  0x6e   : > { %s2697_s21 = sadd.s32 1, %s2443_s24   ;;  %s37_s14 = sadd.s32 1, %s2439_s23 }
  0x6f   : > { %s34_s9 = ssub.s32 %s2443_s24, %s2697_s21  ;;  %p44_p13 = scmp.ne.s32.totalorder %s2439_s23, %s2435_s22 }
  0x70   : > { %p35_p4 = scmp.eq.s32.totalorder %s34_s9, 0  ;;  %p45_p8 = scmp.eq.s32.totalorder %s2443_s24, 0 }
  0x71   : > { %p3006_p6 = scmp.eq.s32.totalorder %s2557_s25, 1  ;;  %p2107_p3 = scmp.lt.s32.totalorder %s2443_s24, 2 }
  0x72   : > { %s2713_s26 = scalar_select %p35_p4, %s2439_s23, %s37_s14  }
  0x73   : > { %p2707_p10 = por %p3006_p6, %p44_p13  ;;  %p46_p5 = por %p45_p8, %p44_p13 }
  0x74   : > { %s404_s30 = sand.u32 1, %s2439_s23   ;;  %s1836_s11 = sshll.u32 %s2443_s24, 8 }
  0x75   : > { %s1790_s15 = sshll.u32 %s404_s30, 4  ;;  %s2720_s13 = scalar_lea.hbm %s2976_s0, %s1836_s11 }
  0x76   : > { %s408_s18 = scalar_lea.vmem [#allocation2], %s1790_s15  ;;  %p2724_p11 = pnand %p2107_p3, %p46_p5 }
  0x77   : > { %s415_s16 = sshll.u32 %s408_s18, 4  ;;  %s2728_s14 = scalar_lea.sflag [#allocation3], %s404_s30  ;;  %s2722_s16 = int_to_ptr.vmem [resolvable:$true] %s415_s16 }
  0x78   : > { %s2339_s9 = scalar_lea.hbm %s2720_s13, 256  ;;  %p2341_p9 = pneg %p2724_p11 }
  0x79   : > { %p2340_p7 = scmp.ne.s32.totalorder %s2720_s13, %s2339_s9  ;;  %s2344_s17 = scalar_lea.hbm %s2976_s0, 512 }
  0x7a   : > { %p2345_p1 = scmp.lt.u32.totalorder %s2720_s13, %s2976_s0  ;;  %p2346_p2 = scmp.lt.u32.totalorder %s2344_s17, %s2339_s9 }
  0x7b   : > { %p2342_p12 = pnand %p2341_p9, %p2340_p7  ;;  %p2348_p4 = scmp.lt.u32.totalorder %s2339_s9, %s2720_s13 }
  0x7c   : > { %p2347_p13 = por %p2346_p2, %p2345_p1 }
  0x7d   : > { %p2343_p0 = pneg %p2342_p12 }
  0x7e   : > { %p2349_p8 = por %p2348_p4, %p2347_p13 }
  0x80   : > { %p2350_p6 = pnand %p2349_p8, %p2343_p0 }
  0x82   : > { %2353 = shalt.err (!%p2350_p6)
}
  0x83   : > { %s2354_s30 = scalar_lea.vmem %s2722_s16, 256  ;;  %s2451_s15 = smov [#allocation2]  }
  0x84   : > { %p2355_p3 = scmp.ne.s32.totalorder %s2722_s16, %s2354_s30  ;;  %s2359_s11 = sshll.u32 %s2451_s15, 4  ;;  %s2360_s11 = int_to_ptr.vmem [resolvable:$false] %s2359_s11 }
  0x85   : > { %s2361_s28 = scalar_lea.vmem %s2360_s11, 512  ;;  %p2362_p12 = scmp.lt.s32.totalorder %s2722_s16, %s2360_s11 }
  0x86   : > { %p2357_p5 = pnand %p2355_p3, %p2341_p9  ;;  %p2363_p1 = scmp.lt.s32.totalorder %s2361_s28, %s2354_s30 }
  0x88   : > { %p2358_p7 = pneg %p2357_p5  ;;  %p2364_p2 = por %p2363_p1, %p2362_p12 }
  0x8a   : > { %p2365_p13 = pnand %p2364_p2, %p2358_p7 }
  0x8c   : > { %2368 = shalt.err (!%p2365_p13)
}
  0x8d   : > { %2098 = dma.hbm_to_vmem [thread:$0]  (!%p2724_p11), %s2720_s13, 256, %s2722_s16, %s2728_s14, %s2448_s19, %s2448_s19, %s2449_s20  }
  0x8e   : > { %p3009_p9 = scmp.ne.s32.totalorder %s3003_s29, 0 }
  0x8f   : > { %s2762_s9 = sand.u32 (!%p3009_p9), 1, %s2435_s22   ;;  %p3010_p0 = scmp.ne.s32.totalorder (!%p3009_p9), %s3000_s27, 0 }
  0x90   : > { %427 = sbr.rel (%p3009_p9) target bundleno = 3635 (0xe33), region = 68  ;;  %s1794_s17 = sshll.u32 (!%p3009_p9), %s2762_s9, 4 }
  0x91   : > { %s430_s18 = scalar_lea.sflag (!%p3009_p9), [#allocation3], %s2762_s9  ;;  %s433_s30 = scalar_lea.vmem (!%p3009_p9), [#allocation2], %s1794_s17 }
  0x97   : > { %2414 = dma.done.wait (%p3010_p0), %s430_s18, 256  }
  0x98   : > { %2416 = vsyncadd (%p3010_p0), %s430_s18, 4294967040  ;;  %p3011_p4 = scmp.eq.s32.totalorder %s2557_s25, 0 }
  0x9a   : > { %2418 = dma.done.wait (%p3011_p4), [#allocation6], 1024   ;;  %p3012_p11 = pmov %p3011_p4 }
  0x9b   : > { %p3013_p8 = pmov %p3011_p4 }
  0x9c   : > { %2420 = vsyncadd (%p3012_p11), [#allocation6], 4294966272 }
  0x9d   : > { %2422 = dma.done.wait (%p3013_p8), [#allocation9], 1024   ;;  %p3014_p6 = pmov %p3011_p4 }
  0x9e   : > { %vm496_vm0 = vcmask 261120   ;;  %v492_v0 = vld [vmem:[#allocation5] sm:$0xff]  ;;  %v493_v1 = vld [vmem:[#allocation5 + $0x8] sm:$0xff]  ;;  %v494_v2 = vld [vmem:[#allocation5 + $0x10] sm:$0xff]  ;;  %v2452_v8 = vmov 0.0|0.0   ;;  %vm2453_vm1 = vmmov 0  }
  0x9f   : > { %2424 = vsyncadd (%p3014_p6), [#allocation9], 4294966272  ;;  %v1998_v3 = vpack.c.bf16 %v493_v1, %v492_v0  ;;  %v495_v4 = vld [vmem:[#allocation5 + $0x18] sm:$0xff]  ;;  %v2778_v5 = vld [vmem:[%s433_s30] sm:$0xff]  ;;  %2006 = vmatprep.subr.bf16.mxu1 %v2452_v8  ;;  %v2454_v9 = vmov 0.0   ;;  %s2455_s27 = smov 120  }
  0xa0   : > { %v2002_v6 = vpack.c.bf16 %v495_v4, %v494_v2  ;;  %1895 = vmatprep.mubr.msk.f32.mxu0 %vm496_vm0, %v2778_v5  ;;  %v491_v7 = vld [vmem:[%s433_s30 + $0x8] sm:$0xff]  ;;  %1902 = vmatprep.mubr.msk.f32.mxu1 %vm2453_vm1, %v2454_v9  ;;  %s2456_s29 = smov 96   ;;  %s2457_s19 = smov 88   ;;  %vm584_vm2 = vcmask 64512   ;;  %vm661_vm4 = vcmask 72704   ;;  %vm681_vm5 = vcmask 1040384  }
  0xa1   : > { %1999 = vmatprep.subr.bf16.mxu0 %v1998_v3  ;;  %vm2799_vm3 = vmpackc.low %vm584_vm2, %vm584_vm2  ;;  %s2458_s20 = smov 56   ;;  %s2459_s13 = smov 64   ;;  %vm2462_vm6 = vmmov 1   ;;  %vm1286_vm8 = vcmask 130048   ;;  %vm1288_vm9 = vcmask 195584  }
  0xa2   : > { %2001 = vmatpush3.bf16.msra.mxu0 %v1998_v3  ;;  %s2460_s16 = smov 80   ;;  %s2461_s7 = smov 112   ;;  %vm2824_vm7 = vmpackc.low %vm681_vm5, %vm2462_vm6 }
  0xa3   : > { %2003 = vmatprep.subr.bf16.mxu0 %v2002_v6  ;;  %s2463_s14 = smov 72   ;;  %s2464_s15 = smov 104  }
  0xa4   : > { %s2465_s11 = smov 48   ;;  %s2466_s28 = smov 40  }
  0xa5   : > { %s2467_s17 = smov 16   ;;  %s2468_s18 = smov 8  }
  0xa6   : > { %2005 = vmatpush3.bf16.msra.mxu0 %v2002_v6  ;;  %s2469_s30 = smov 24  }
  0xa7   : > { %2010 = vmatprep.subr.bf16.mxu0 %v2452_v8 }
  0xa9   : > { %1896 = vmatmul.mubr.msk.f32.vlgmr.msra.gmra.mrb[0].mxu0 %vm496_vm0, %v491_v7 }
  0xaa   : > { %1909 = vmatprep.mubr.msk.f32.mxu0 %vm2453_vm1, %v2454_v9 }
 0x17c   : > { %v1897_v10 = vpop.f32.mrb[0].mxu0 }
 0x17d   : > { %v2789_v11 = vpop.f32.mrb[1].mxu0 }
 0x17e   : > { %754 = vrot.lane.b32.xlu1 %v2789_v11, %s2455_s27  ;;  %v2793_v12 = vpack.i.bf16 %v1897_v10, %v2789_v11 }
 0x180   : > { %2170 = vrot.lane.b32.xlu0 %v2793_v12, %s2456_s29  ;;  %s3022_s29 = sld [smem:[#allocation21_spill]] }
 0x184   : > { %2175 = vrot.lane.b32.xlu0 %v2793_v12, %s2457_s19 }
 0x1f0   : > { %v755_v22 = vpop.permute.xlu1 %754 }
 0x1f2   : > { %v2171_v13 = vpop.permute.xlu0 %2170 }
 0x1f3   : > { %v2173_v14 = vunpack.i.h.bf16 %v2171_v13  ;;  %v2172_v15 = vunpack.i.l.bf16 %v2171_v13 }
 0x1f5   : > { %v2007_v17 = vpack.c.bf16 %v2173_v14, %v2172_v15 }
 0x1f6   : > { %v2176_v18 = vpop.permute.xlu0 %2175 }
 0x1f7   : > { %2009 = vmatpush3.bf16.xpose.msk.msra.mxu1 %vm2799_vm3, %v2007_v17  ;;  %v2178_v19 = vunpack.i.h.bf16 %v2176_v18  ;;  %v2177_v20 = vunpack.i.l.bf16 %v2176_v18 }
 0x1f8   : > { %2014 = vmatprep.subr.bf16.mxu1 %v2452_v8 }
 0x1f9   : > { %v2015_v21 = vpack.c.bf16 %v2178_v19, %v2177_v20 }
 0x1fe   : > { %1903 = vmatmul.mubr.msk.f32.vlgmr.msra.gmra.mrb[0].mxu1 %vm584_vm2, %v2789_v11 }
 0x1ff   : > { %2017 = vmatpush3.bf16.xpose.msk.msra.mxu1 %vm2799_vm3, %v2015_v21  ;;  %1916 = vmatprep.mubr.msk.f32.mxu1 %vm2453_vm1, %v2454_v9 }
 0x200   : > { %2026 = vmatprep.subr.bf16.mxu1 %v2452_v8 }
 0x206   : > { %1917 = vmatmul.mubr.msk.f32.vlgmr.msra.gmra.mrb[2].mxu1 %vm584_vm2, %v755_v22 }
 0x207   : > { %1937 = vmatprep.mubr.msk.f32.mxu1 %vm2453_vm1, %v2454_v9 }
 0x2d1   : > { %v657_v23 = vpop.f32.mrb[0].mxu1 }
 0x2d2   : > { %v1904_v24 = vpop.f32.mrb[1].mxu1  ;;  %v662_v25 = vsel %vm661_vm4, %v657_v23, -inf }
 0x2d3   : > { %663 = vmax.xlane.f32.xlu1 %v662_v25 }
 0x2d9   : > { %v832_v26 = vpop.f32.mrb[2].mxu1 }
 0x2da   : > { %v1918_v27 = vpop.f32.mrb[3].mxu1  ;;  %v836_v28 = vsel %vm661_vm4, %v832_v26, -inf }
 0x2db   : > { %837 = vmax.xlane.f32.xlu0 %v836_v28 }
 0x2e4   : > { %2185 = vrot.lane.b32.xlu1 %v2793_v12, %s2458_s20  ;;  %s1662_s20 = scalar_lea.sflag [#allocation4], %s2762_s9 }
 0x360   : > { %v664_v29 = vpop.xlane.xlu1 %663 }
 0x361   : > { %v665_v30 = vsub.f32 %v657_v23, %v664_v29 }
 0x363   : > { %v666_v31 = vmul.f32 1.442695, %v665_v30 }
 0x364   : > { %v2186_v40 = vpop.permute.xlu1 %2185 }
 0x365   : > { %2209 = vpow2.f32 %v666_v31  ;;  %v2188_v47 = vunpack.i.h.bf16 %v2186_v40  ;;  %v2187_v48 = vunpack.i.l.bf16 %v2186_v40  ;;  %v1291_v40 = vld [vmem:[#allocation7 + $0x8] sm:$0xff] }
 0x367   : > { %v2019_v51 = vpack.c.bf16 %v2188_v47, %v2187_v48 }
 0x368   : > { %v838_v32 = vpop.xlane.xlu0 %837 }
 0x369   : > { %v839_v33 = vsub.f32 %v832_v26, %v838_v32 }
 0x36b   : > { %v840_v34 = vmul.f32 1.442695, %v839_v33 }
 0x36d   : > { %2211 = vpow2.f32 %v840_v34 }
 0x36f   : > { %v2210_v35 = vpop.eup %2209 }
 0x370   : > { %v668_v36 = vsel %vm661_vm4, %v2210_v35, 0.0 }
 0x371   : > { %669 = vadd.xlane.f32.xlu0 %v668_v36 }
 0x377   : > { %v2212_v37 = vpop.eup %2211 }
 0x378   : > { %v842_v38 = vsel %vm661_vm4, %v2212_v37, 0.0 }
 0x379   : > { %843 = vadd.xlane.f32.xlu1 %v842_v38 }
 0x387   : > { %2180 = vrot.lane.b32.xlu0 %v2793_v12, %s2459_s13 }
 0x38a   : > { %2190 = vrot.lane.b32.xlu1 %v2793_v12, %s2460_s16  ;;  %s3020_s16 = sld [smem:[#allocation19_spill]] }
 0x38b   : > { %927 = vrot.lane.b32.xlu0 %v2789_v11, %s2461_s7  ;;  %s1799_s7 = sshll.u32 %s2762_s9, 3 }
 0x3fe   : > { %v670_v39 = vpop.xlane.xlu0 %669 }
 0x3ff   : > { %2213 = vrcp.f32 %v670_v39  ;;  %v1290_v39 = vld [vmem:[#allocation7] sm:$0xff] }
 0x402   : > { %v2181_v41 = vpop.permute.xlu0 %2180 }
 0x403   : > { %v2183_v42 = vunpack.i.h.bf16 %v2181_v41  ;;  %v2182_v43 = vunpack.i.l.bf16 %v2181_v41  ;;  %v1292_v41 = vld [vmem:[#allocation7 + $0x10] sm:$0xff] }
 0x405   : > { %v2011_v45 = vpack.c.bf16 %v2183_v42, %v2182_v43  ;;  %v2039_v42 = vpack.c.bf16 %v1291_v40, %v1290_v39  ;;  %v1293_v43 = vld [vmem:[#allocation7 + $0x18] sm:$0xff] }
 0x406   : > { %v844_v46 = vpop.xlane.xlu1 %843  ;;  %v928_v58 = vpop.permute.xlu0 %927  ;;  %v2042_v44 = vpack.c.bf16 %v1293_v43, %v1292_v41 }
 0x407   : > { %2215 = vrcp.f32 %v844_v46  ;;  %2013 = vmatpush3.bf16.msk.msra.mxu0 %vm2824_vm7, %v2011_v45 }
 0x408   : > { %2018 = vmatprep.subr.bf16.mxu0 %v2452_v8 }
 0x409   : > { %v2214_v49 = vpop.eup %2213 }
 0x40a   : > { %v672_v50 = vmul.f32 %v2214_v49, %v2210_v35  ;;  %v2191_v52 = vpop.permute.xlu1 %2190 }
 0x40b   : > { %v2193_v53 = vunpack.i.h.bf16 %v2191_v52  ;;  %v2192_v54 = vunpack.i.l.bf16 %v2191_v52 }
 0x40c   : > { %1910 = vmatmul.mubr.msk.f32.vlgmr.msra.gmra.mrb[2].mxu0 %vm661_vm4, %v672_v50 }
 0x40d   : > { %2021 = vmatpush3.bf16.msk.msra.mxu0 %vm2824_vm7, %v2019_v51  ;;  %1923 = vmatprep.mubr.msk.f32.mxu0 %vm2453_vm1, %v2454_v9  ;;  %v2023_v57 = vpack.c.bf16 %v2193_v53, %v2192_v54  ;;  %v1822_v53 = vld [vmem:[%s2979_s3] ss:$0 sm:$0xff] }
 0x40e   : > { %2022 = vmatprep.subr.bf16.mxu0 %v2452_v8 }
 0x411   : > { %v2216_v55 = vpop.eup %2215 }
 0x412   : > { %v846_v56 = vmul.f32 %v2216_v55, %v2212_v37 }
 0x414   : > { %1924 = vmatmul.mubr.msk.f32.vlgmr.msra.gmra.mrb[4].mxu0 %vm661_vm4, %v846_v56 }
 0x415   : > { %1930 = vmatprep.mubr.msk.f32.mxu0 %vm2453_vm1, %v2454_v9 }
 0x416   : > { %2025 = vmatpush3.bf16.xpose.msk.msra.mxu0 %vm2799_vm3, %v2023_v57 }
 0x417   : > { %2034 = vmatprep.subr.bf16.mxu0 %v2452_v8 }
 0x41d   : > { %1931 = vmatmul.mubr.msk.f32.vlgmr.msra.gmra.mrb[6].mxu0 %vm584_vm2, %v928_v58 }
 0x41e   : > { %1951 = vmatprep.mubr.msk.f32.mxu0 %vm2453_vm1, %v2454_v9 }
 0x4df   : > { %v2846_v59 = vpop.f32.mrb[2].mxu0 }
 0x4e0   : > { %v1911_v60 = vpop.f32.mrb[3].mxu0 }
 0x4e7   : > { %v2848_v61 = vpop.f32.mrb[4].mxu0 }
 0x4e8   : > { %v1925_v62 = vpop.f32.mrb[5].mxu0 }
 0x4f0   : > { %v1005_v63 = vpop.f32.mrb[6].mxu0 }
 0x4f1   : > { %v1932_v0 = vpop.f32.mrb[7].mxu0  ;;  %v1009_v1 = vsel %vm661_vm4, %v1005_v63, -inf }
 0x4f2   : > { %1010 = vmax.xlane.f32.xlu1 %v1009_v1  ;;  %v1405_v0 = vld [vmem:[#allocation8] sm:$0xff]  ;;  %v1406_v1 = vld [vmem:[#allocation8 + $0x8] sm:$0xff] }
 0x503   : > { %2200 = vrot.lane.b32.xlu1 %v2793_v12, %s2463_s14 }
 0x507   : > { %1100 = vrot.lane.b32.xlu1 %v2789_v11, %s2464_s15 }
 0x57f   : > { %v1011_v2 = vpop.xlane.xlu1 %1010 }
 0x580   : > { %v1012_v3 = vsub.f32 %v1005_v63, %v1011_v2  ;;  %v2045_v2 = vpack.c.bf16 %v1406_v1, %v1405_v0 }
 0x582   : > { %v1013_v4 = vmul.f32 1.442695, %v1012_v3  ;;  %v1407_v3 = vld [vmem:[#allocation8 + $0x10] sm:$0xff] }
 0x583   : > { %v2201_v18 = vpop.permute.xlu1 %2200 }
 0x584   : > { %2217 = vpow2.f32 %v1013_v4  ;;  %v2203_v19 = vunpack.i.h.bf16 %v2201_v18  ;;  %v2202_v20 = vunpack.i.l.bf16 %v2201_v18  ;;  %v1408_v4 = vld [vmem:[#allocation8 + $0x18] sm:$0xff]  ;;  %v1824_v18 = vld [vmem:[%s2980_s4] ss:$0 sm:$0xff] }
 0x586   : > { %v2031_v22 = vpack.c.bf16 %v2203_v19, %v2202_v20  ;;  %v1825_v19 = vld [vmem:[%s2981_s5] ss:$0 sm:$0xff] }
 0x587   : > { %v1101_v23 = vpop.permute.xlu1 %1100 }
 0x58e   : > { %v2218_v6 = vpop.eup %2217 }
 0x58f   : > { %v1015_v7 = vsel %vm661_vm4, %v2218_v6, 0.0 }
 0x590   : > { %1016 = vadd.xlane.f32.xlu0 %v1015_v7  ;;  %v1491_v7 = vld [vmem:[#allocation10 + $0x8] sm:$0xff] }
 0x5a6   : > { %2195 = vrot.lane.b32.xlu0 %v2793_v12, %s2465_s11  ;;  %s3021_s11 = sld [smem:[#allocation20_spill]] }
 0x61d   : > { %v1017_v10 = vpop.xlane.xlu0 %1016 }
 0x61e   : > { %2219 = vrcp.f32 %v1017_v10 }
 0x621   : > { %v2196_v13 = vpop.permute.xlu0 %2195 }
 0x622   : > { %v2198_v14 = vunpack.i.h.bf16 %v2196_v13  ;;  %v2197_v15 = vunpack.i.l.bf16 %v2196_v13 }
 0x624   : > { %v2027_v17 = vpack.c.bf16 %v2198_v14, %v2197_v15 }
 0x626   : > { %2029 = vmatpush3.bf16.msk.msra.mxu1 %vm2824_vm7, %v2027_v17 }
 0x627   : > { %2030 = vmatprep.subr.bf16.mxu1 %v2452_v8 }
 0x628   : > { %v2220_v11 = vpop.eup %2219 }
 0x629   : > { %v1019_v21 = vmul.f32 %v2220_v11, %v2218_v6  ;;  %v2048_v6 = vpack.c.bf16 %v1408_v4, %v1407_v3 }
 0x62b   : > { %1938 = vmatmul.mubr.msk.f32.vlgmr.msra.gmra.mrb[4].mxu1 %vm661_vm4, %v1019_v21 }
 0x62c   : > { %1944 = vmatprep.mubr.msk.f32.mxu1 %vm2453_vm1, %v2454_v9 }
 0x62f   : > { %2033 = vmatpush3.bf16.xpose.msk.msra.mxu1 %vm2799_vm3, %v2031_v22  ;;  %v1492_v22 = vld [vmem:[#allocation10 + $0x10] sm:$0xff] }
 0x630   : > { %2044 = vmatprep.subr.bf16.mxu1 %v2452_v8 }
 0x636   : > { %1945 = vmatmul.mubr.msk.f32.vlgmr.msra.gmra.mrb[6].mxu1 %vm584_vm2, %v1101_v23  ;;  %v1493_v23 = vld [vmem:[#allocation10 + $0x18] sm:$0xff] }
 0x637   : > { %1973 = vmatprep.mubr.msk.f32.mxu1 %vm2453_vm1, %v2454_v9  ;;  %2046 = vmatpush3.bf16.msra.mxu1 %v2045_v2 }
 0x638   : > { %2047 = vmatprep.subr.bf16.mxu1 %v2452_v8 }
 0x63b   : > { %2049 = vmatpush3.bf16.msra.mxu1 %v2048_v6 }
 0x63c   : > { %2056 = vmatprep.subr.bf16.mxu1 %v2452_v8 }
 0x6fe   : > { %v1096_v24 = vpop.f32.mrb[4].mxu1 }
 0x6ff   : > { %v1939_v25 = vpop.f32.mrb[5].mxu1 }
 0x700   : > { %v1575_v25 = vld [vmem:[%s2986_s10] sm:$0xff] }
 0x709   : > { %v1178_v26 = vpop.f32.mrb[6].mxu1 }
 0x70a   : > { %v1946_v27 = vpop.f32.mrb[7].mxu1  ;;  %v1182_v28 = vsel %vm661_vm4, %v1178_v26, -inf }
 0x70b   : > { %1183 = vmax.xlane.f32.xlu0 %v1182_v28 }
 0x721   : > { %2205 = vrot.lane.b32.xlu0 %v2793_v12, %s2466_s28  ;;  %s1833_s28 = sshll.u32 %s2557_s25, 7  ;;  %s2470_s25 = smov [#allocation11]  }
 0x722   : > { %s2931_s19 = scalar_lea.hbm %s3022_s29, %s1833_s28 }
 0x725   : > { %1278 = vrot.lane.b32.xlu0 %v1096_v24, %s2467_s17  ;;  %v2054_v24 = vpack.c.bf16 %v1493_v23, %v1492_v22  ;;  %s489_s17 = scalar_lea.vmem [#allocation11], %s1799_s7 }
 0x798   : > { %v1184_v16 = vpop.xlane.xlu0 %1183 }
 0x799   : > { %v1185_v29 = vsub.f32 %v1178_v26, %v1184_v16  ;;  %v1576_v26 = vld [vmem:[%s2986_s10 + $0x8] sm:$0xff] }
 0x79a   : > { %v2057_v27 = vpack.c.bf16 %v1576_v26, %v1575_v25 }
 0x79b   : > { %v1186_v30 = vmul.f32 1.442695, %v1185_v29 }
 0x79c   : > { %v2206_v31 = vpop.permute.xlu0 %2205 }
 0x79d   : > { %2221 = vpow2.f32 %v1186_v30  ;;  %v2208_v32 = vunpack.i.h.bf16 %v2206_v31  ;;  %v2207_v33 = vunpack.i.l.bf16 %v2206_v31  ;;  %v1577_v31 = vld [vmem:[%s2986_s10 + $0x10] sm:$0xff] }
 0x79f   : > { %v2035_v34 = vpack.c.bf16 %v2208_v32, %v2207_v33  ;;  %v1828_v33 = vld [vmem:[%s3020_s16] ss:$0 sm:$0xff]  ;;  %s2373_s16 = sshll.u32 %s2470_s25, 4  ;;  %s2374_s16 = int_to_ptr.vmem [resolvable:$false] %s2373_s16 }
 0x7a0   : > { %v1279_v49 = vpop.permute.xlu0 %1278  ;;  %s2375_s7 = scalar_lea.vmem %s2374_s16, 256 }
 0x7a1   : > { %2037 = vmatpush3.bf16.msk.msra.mxu0 %vm2824_vm7, %v2035_v34 }
 0x7a2   : > { %2038 = vmatprep.subr.bf16.mxu0 %v2452_v8 }
 0x7a7   : > { %v2222_v35 = vpop.eup %2221 }
 0x7a8   : > { %v1188_v36 = vsel %vm661_vm4, %v2222_v35, 0.0 }
 0x7a9   : > { %1189 = vadd.xlane.f32.xlu1 %v1188_v36 }
 0x7ba   : > { %1274 = vrot.lane.b32.xlu1 %v2848_v61, %s2468_s18  ;;  %s3019_s18 = sld [smem:[#allocation18_spill]] }
 0x836   : > { %v1190_v12 = vpop.xlane.xlu1 %1189 }
 0x837   : > { %2223 = vrcp.f32 %v1190_v12 }
 0x83a   : > { %v1275_v47 = vpop.permute.xlu1 %1274 }
 0x83b   : > { %v1285_v48 = vsel %vm584_vm2, %v2846_v59, %v1275_v47 }
 0x83c   : > { %v1287_v50 = vsel %vm1286_vm8, %v1285_v48, %v1279_v49 }
 0x841   : > { %v2224_v37 = vpop.eup %2223 }
 0x842   : > { %v1192_v38 = vmul.f32 %v2224_v37, %v2222_v35  ;;  %v1830_v37 = vld [vmem:[%s3021_s11] ss:$0 sm:$0xff] }
 0x844   : > { %1952 = vmatmul.mubr.msk.f32.vlgmr.msra.gmra.mrb[8].mxu0 %vm661_vm4, %v1192_v38 }
 0x845   : > { %1962 = vmatprep.mubr.msk.f32.mxu0 %vm2453_vm1, %v2454_v9  ;;  %2040 = vmatpush3.bf16.msra.mxu0 %v2039_v42 }
 0x846   : > { %2041 = vmatprep.subr.bf16.mxu0 %v2452_v8 }
 0x849   : > { %2043 = vmatpush3.bf16.msra.mxu0 %v2042_v44 }
 0x84a   : > { %2050 = vmatprep.subr.bf16.mxu0 %v2452_v8 }
 0x917   : > { %v1269_v45 = vpop.f32.mrb[8].mxu0 }
 0x918   : > { %1282 = vrot.lane.b32.xlu1 %v1269_v45, %s2469_s30  ;;  %v1953_v46 = vpop.f32.mrb[9].mxu0 }
 0x98a   : > { %v1283_v51 = vpop.permute.xlu1 %1282 }
 0x98b   : > { %v1289_v52 = vsel %vm1288_vm9, %v1287_v50, %v1283_v51 }
 0x98c   : > { %1963 = vmatmul.mubr.msk.f32.vlgmr.msra.gmra.mrb[10].mxu0 %vm496_vm0, %v1289_v52 }
 0x98d   : > { %1984 = vmatprep.mubr.msk.f32.mxu0 %vm2453_vm1, %v2454_v9 }
 0xa5f   : > { %v1370_v54 = vpop.f32.mrb[10].mxu0 }
 0xa60   : > { %v1371_v55 = vadd.f32 %v1822_v53, %v1370_v54  ;;  %v1964_v56 = vpop.f32.mrb[11].mxu0 }
 0xa62   : > { %v1374_v57 = vadd.f32 %v1371_v55, %v2778_v5  ;;  %v1490_v5 = vld [vmem:[#allocation10] sm:$0xff] }
 0xa63   : > { %v2051_v10 = vpack.c.bf16 %v1491_v7, %v1490_v5 }
 0xa64   : > { %v1375_v58 = vsel %vm496_vm0, %v1374_v57, 0.0 }
 0xa65   : > { %1376 = vadd.xlane.f32.xlu0 %v1375_v58  ;;  %2052 = vmatpush3.bf16.msra.mxu0 %v2051_v10 }
 0xa66   : > { %2053 = vmatprep.subr.bf16.mxu0 %v2452_v8 }
 0xa69   : > { %2055 = vmatpush3.bf16.msra.mxu0 %v2054_v24 }
 0xaf2   : > { %v1377_v59 = vpop.xlane.xlu0 %1376 }
 0xaf3   : > { %v1379_v60 = vmul.f32 0.03125, %v1377_v59 }
 0xaf5   : > { %v1380_v61 = vsub.f32 %v1374_v57, %v1379_v60 }
 0xaf7   : > { %v1381_v62 = vmul.f32 %v1380_v61, %v1380_v61 }
 0xaf9   : > { %v1382_v63 = vsel %vm496_vm0, %v1381_v62, 0.0 }
 0xafa   : > { %1383 = vadd.xlane.f32.xlu1 %v1382_v63 }
 0xb87   : > { %v1384_v13 = vpop.xlane.xlu1 %1383 }
 0xb88   : > { %v1385_v14 = vmul.f32 0.03125, %v1384_v13 }
 0xb8a   : > { %v1386_v15 = vadd.f32 1e-05, %v1385_v14 }
 0xb8c   : > { %2225 = vrsqrt.f32 %v1386_v15 }
 0xb96   : > { %v2226_v17 = vpop.eup %2225 }
 0xb97   : > { %v1388_v11 = vmul.f32 %v2226_v17, %v1380_v61 }
 0xb99   : > { %v1396_v20 = vmul.f32 %v1824_v18, %v1388_v11 }
 0xb9b   : > { %v1404_v21 = vadd.f32 %v1825_v19, %v1396_v20 }
 0xb9d   : > { %1974 = vmatmul.mubr.msk.f32.vlgmr.msra.gmra.mrb[8].mxu1 %vm496_vm0, %v1404_v21 }
 0xb9e   : > { %1995 = vmatprep.mubr.msk.f32.mxu1 %vm2453_vm1, %v2454_v9  ;;  %2058 = vmatpush3.bf16.msra.mxu1 %v2057_v27  ;;  %v1826_v9 = vld [vmem:[%s3019_s18] ss:$0 sm:$0xff]  ;;  %s1675_s18 = sshll.u32 %s489_s17, 4  ;;  %s2933_s18 = int_to_ptr.vmem [resolvable:$true] %s1675_s18 }
 0xb9f   : > { %2059 = vmatprep.subr.bf16.mxu1 %v2452_v8  ;;  %v1578_v8 = vld [vmem:[%s2986_s10 + $0x18] sm:$0xff]  ;;  %s2369_s13 = scalar_lea.vmem %s2933_s18, 128  ;;  %p2376_p12 = scmp.lt.s32.totalorder %s2933_s18, %s2374_s16 }
 0xba0   : > { %v2060_v32 = vpack.c.bf16 %v1578_v8, %v1577_v31  ;;  %p2370_p3 = scmp.ne.s32.totalorder %s2933_s18, %s2369_s13  ;;  %p2377_p1 = scmp.lt.s32.totalorder %s2375_s7, %s2369_s13 }
 0xba2   : > { %2061 = vmatpush3.bf16.msra.mxu1 %v2060_v32  ;;  %p2371_p5 = pnand %p2370_p3, %p2707_p10  ;;  %p2378_p2 = por %p2377_p1, %p2376_p12 }
 0xba4   : > { %p2372_p7 = pneg %p2371_p5 }
 0xba6   : > { %p2379_p13 = pnand %p2378_p2, %p2372_p7 }
 0xc70   : > { %v1485_v28 = vpop.f32.mrb[8].mxu1 }
 0xc71   : > { %v1486_v16 = vadd.f32 %v1826_v9, %v1485_v28  ;;  %v1975_v29 = vpop.f32.mrb[9].mxu1 }
 0xc73   : > { %v1489_v30 = vmax.f32 %v1486_v16, 0.0 }
 0xc75   : > { %1985 = vmatmul.mubr.msk.f32.vlgmr.msra.gmra.mrb[12].mxu0 %vm496_vm0, %v1489_v30 }
 0xd48   : > { %v1570_v34 = vpop.f32.mrb[12].mxu0 }
 0xd49   : > { %v1571_v35 = vadd.f32 %v1828_v33, %v1570_v34  ;;  %v1986_v36 = vpop.f32.mrb[13].mxu0 }
 0xd4b   : > { %v1574_v12 = vmax.f32 %v1571_v35, 0.0 }
 0xd4d   : > { %1996 = vmatmul.mubr.msk.f32.vlgmr.msra.gmra.mrb[10].mxu1 %vm496_vm0, %v1574_v12 }
 0xe20   : > { %v1655_v38 = vpop.f32.mrb[10].mxu1 }
 0xe21   : > { %v1656_v39 = vadd.f32 %v1830_v37, %v1655_v38  ;;  %v1997_v40 = vpop.f32.mrb[11].mxu1 }
 0xe23   : > { %v1659_v41 = vadd.f32 %v1656_v39, %v1404_v21 }
 0xe25   : > { %1660 = vst.msk [vmem:[%s489_s17] sm:$0xff] %vm496_vm0, %v1659_v41 }
 0xe26   : > { %2382 = shalt.err (!%p2379_p13)
}
 0xe27   : > { %s2383_s9 = scalar_lea.hbm %s2931_s19, 128  ;;  %s2387_s11 = scalar_lea.hbm %s3022_s29, 256 }
 0xe28   : > { %p2384_p9 = scmp.ne.s32.totalorder %s2931_s19, %s2383_s9  ;;  %p2388_p11 = scmp.lt.u32.totalorder %s2931_s19, %s3022_s29 }
 0xe29   : > { %p2389_p8 = scmp.lt.u32.totalorder %s2387_s11, %s2383_s9  ;;  %p2391_p3 = scmp.lt.u32.totalorder %s2383_s9, %s2931_s19 }
 0xe2a   : > { %p2385_p0 = pnand %p2384_p9, %p2707_p10 }
 0xe2b   : > { %p2390_p6 = por %p2389_p8, %p2388_p11 }
 0xe2c   : > { %p2386_p4 = pneg %p2385_p0 }
 0xe2d   : > { %p2392_p5 = por %p2391_p3, %p2390_p6 }
 0xe2f   : > { %p2393_p7 = pnand %p2392_p5, %p2386_p4 }
 0xe31   : > { %2396 = shalt.err (!%p2393_p7)
}
 0xe32   : > { %2080 = dma.vmem_to_hbm [thread:$0]  (%p2707_p10), %s2933_s18, 128, %s2931_s19, %s1662_s20  }
 0xe33 PF: > { %s3023_s30 = sld [smem:[#allocation16_spill]]  ;;  %s3024_s27 = sld [smem:[#allocation17_spill]] }
 0xe34   : > { %p3026_p1 = scmp.ge.s32.totalorder %s2443_s24, 2 }
 0xe39   : > { %s1687_s13 = sand.u32 1, %s3023_s30   ;;  %p3025_p12 = scmp.ne.s32.totalorder %s3024_s27, 0 }
 0xe3a   : > { %s1688_s25 = scalar_lea.sflag [#allocation4], %s1687_s13 }
 0xe3b   : > { %p2100_p2 = pnand %p3026_p1, %p3025_p12 }
 0xe3d   : > { %2426 = dma.done.wait (!%p2100_p2), %s1688_s25, 128  }
 0xe3e   : > { %2428 = vsyncadd (!%p2100_p2), %s1688_s25, 4294967168  ;;  %s3027_s16 = smov %s2697_s21  ;;  %p27_p13 = scmp.ge.s32.totalorder %s2697_s21, 4  }
 0xe3f   : > { %s3028_s21 = smov %s2435_s22  ;;  %s3029_s22 = smov %s2439_s23 }
 0xe40   : > { %s3030_s23 = smov %s2713_s26  ;;  %s3031_s24 = smov %s3027_s16 }
 0xe41   :  { %29 = sbr.rel (!%p27_p13) target bundleno = 12 (0xc), region = 129 }
 0xe48   :  { %1693 = vsyncpa [#allocation3], 1 }
 0xe49   :  { %1695 = vsyncpa [#allocation3 + $0x1], 1 }
 0xe4a   :  { %1696 = vsyncpa [#allocation6], 1 }
 0xe4b   :  { %1697 = vsyncpa [#allocation9], 1 }
 0xe4c   :  { %1698 = vsyncpa [#allocation4], 1 }
 0xe4d   :  { %1700 = vsyncpa [#allocation4 + $0x1], 1 }

</bundles_post_ra>
